<compile_context>
chip_gen: v5e
topology: v5e:2x2
jax: 0.10.0
libtpu: 0.0.40
codegen_flags: <defaults>
</compile_context>

<pallas_src>
import functools

import jax
import jax.numpy as jnp
from jax import lax
from jax.experimental import pallas as pl
from jax.experimental.pallas import tpu as pltpu


def _round_up(x, m):
    return ((x + m - 1) // m) * m


def _weighted_ce_kernel(x_ref, t_ref, w_ref, lsum_ref, wsum_ref, *,
                        hw, tile_rows, needs_mask):
    # x_ref:    (1, C, R, 128)  logits tile (class axis leading, pixels dense)
    # t_ref:    (1, 1, R, 128)  int32 targets
    # w_ref:    (C, 1, 1)       per-class weights
    # lsum_ref: (1, 1, 8, 128)  per-tile weighted-NLL partial sums
    # wsum_ref: (1, 1, 8, 128)  per-tile weight partial sums
    i = pl.program_id(1)

    x = x_ref[0].astype(jnp.float32)            # (C, R, 128)
    t = t_ref[0]                                 # (1, R, 128) int32
    w = w_ref[...].astype(jnp.float32)           # (C, 1, 1)

    C, R, L = x.shape

    # Numerically-stable log-sum-exp over the class (leading) axis:
    # all reductions are elementwise ops across C dense (R,128) slabs.
    m = jnp.max(x, axis=0, keepdims=True)                                 # (1,R,L)
    lse = m + jnp.log(jnp.sum(jnp.exp(x - m), axis=0, keepdims=True))     # (1,R,L)

    # Select target logit / target-class weight with where-selects.
    cls = lax.broadcasted_iota(jnp.int32, (C, 1, 1), 0)                   # (C,1,1)
    hit = cls == t                                                        # (C,R,L)
    x_t = jnp.sum(jnp.where(hit, x, 0.0), axis=0, keepdims=True)          # (1,R,L)
    w_t = jnp.sum(jnp.where(hit, w, 0.0), axis=0, keepdims=True)          # (1,R,L)

    loss = w_t * (lse - x_t)                                              # (1,R,L)

    if needs_mask:
        # Mask pixels past the true pixel count (pad region / partial last
        # tile).  Mask the loss itself, not just w_t: garbage logits can make
        # lse Inf/NaN and 0*Inf = NaN would leak into the sum.
        row = lax.broadcasted_iota(jnp.int32, (1, R, L), 1)
        lane = lax.broadcasted_iota(jnp.int32, (1, R, L), 2)
        p = (i * tile_rows + row) * L + lane
        valid = p < hw
        loss = jnp.where(valid, loss, 0.0)
        w_t = jnp.where(valid, w_t, 0.0)

    # Per-tile reduction to a single dense (8,128) vreg each (VALU-only adds).
    lsum_ref[0, 0] = jnp.sum(loss.reshape(R // 8, 8, L), axis=0)
    wsum_ref[0, 0] = jnp.sum(w_t.reshape(R // 8, 8, L), axis=0)


def _choose_tile_rows(C, r_total, itemsize, target_bytes=4 << 20, max_rows=2048):
    # Size the logits block (~C * rows * 128 * itemsize) near target_bytes,
    # keep rows a multiple of 8, and never exceed the (padded) image.
    rows = target_bytes // max(1, C * 128 * itemsize)
    rows = max(8, min(max_rows, (rows // 8) * 8))
    return min(rows, r_total)


def weighted_cross_entropy(logits_nchw, targets_nhw, weight, *, reduction="mean"):
    """Weighted softmax cross-entropy.

    logits_nchw: (N, C, H, W) float (f32 or bf16); targets_nhw: (N, H, W) int;
    weight: (C,) float.  Returns a scalar ('mean' = PyTorch weighted mean,
    'sum' = weighted sum).
    """
    N, C, H, W = logits_nchw.shape
    HW = H * W

    # Free, contiguous reshapes; pad the pixel axis to a multiple of 1024
    # (8 sublanes * 128 lanes) only if needed so it re-blocks to (R, 128).
    HW_pad = _round_up(HW, 8 * 128)
    x = logits_nchw.reshape(N, C, HW)
    t = targets_nhw.reshape(N, 1, HW).astype(jnp.int32)
    if HW_pad != HW:
        pad = HW_pad - HW
        x = jnp.pad(x, ((0, 0), (0, 0), (0, pad)))
        t = jnp.pad(t, ((0, 0), (0, 0), (0, pad)))
    r_total = HW_pad // 128
    x = x.reshape(N, C, r_total, 128)
    t = t.reshape(N, 1, r_total, 128)
    w = weight.reshape(C, 1, 1).astype(jnp.float32)

    itemsize = jnp.dtype(logits_nchw.dtype).itemsize
    tile_rows = _choose_tile_rows(C, r_total, itemsize)
    num_tiles = pl.cdiv(r_total, tile_rows)
    needs_mask = HW != num_tiles * tile_rows * 128
    grid = (N, num_tiles)

    # Explicit VMEM budget sized to the actual (double-buffered) blocks.
    x_block = C * tile_rows * 128 * itemsize
    t_block = tile_rows * 128 * 4
    out_block = 8 * 128 * 4
    w_block = C * 8 * 128 * 4  # (C,1,1) pads to (C,8,128) in VMEM
    vmem_needed = 2 * (x_block + t_block) + 4 * out_block + w_block + (2 << 20)
    vmem_limit = int(min(max(vmem_needed, 8 << 20), 48 << 20))

    kern = functools.partial(_weighted_ce_kernel, hw=HW, tile_rows=tile_rows,
                             needs_mask=needs_mask)

    lpart, wpart = pl.pallas_call(
        kern,
        out_shape=(
            jax.ShapeDtypeStruct((N, num_tiles, 8, 128), jnp.float32),
            jax.ShapeDtypeStruct((N, num_tiles, 8, 128), jnp.float32),
        ),
        grid_spec=pltpu.PrefetchScalarGridSpec(
            num_scalar_prefetch=0,
            grid=grid,
            in_specs=[
                pl.BlockSpec((1, C, tile_rows, 128), lambda n, i: (n, 0, i, 0)),
                pl.BlockSpec((1, 1, tile_rows, 128), lambda n, i: (n, 0, i, 0)),
                pl.BlockSpec((C, 1, 1), lambda n, i: (0, 0, 0)),
            ],
            out_specs=[
                pl.BlockSpec((1, 1, 8, 128), lambda n, i: (n, i, 0, 0)),
                pl.BlockSpec((1, 1, 8, 128), lambda n, i: (n, i, 0, 0)),
            ],
        ),
        compiler_params=pltpu.CompilerParams(
            dimension_semantics=("parallel", "parallel"),
            vmem_limit_bytes=vmem_limit),
    )(x, t, w)

    lsum = jnp.sum(lpart)
    wsum = jnp.sum(wpart)
    if reduction == "mean":
        return lsum / wsum          # PyTorch weighted-mean semantics
    elif reduction == "sum":
        return lsum
    else:
        raise ValueError(reduction)


if __name__ == "__main__":
    key = jax.random.PRNGKey(0)
    k1, k2 = jax.random.split(key)

    N, C, H, W = 2, 4, 16, 16
    logits = jax.random.normal(k1, (N, C, H, W), dtype=jnp.float32)
    targets = jax.random.randint(k2, (N, H, W), 0, C, dtype=jnp.int32)
    # deterministic per-class weights (the buffer registered in __init__)
    weight = jnp.linspace(0.5, 2.0, C, dtype=jnp.float32)

    loss = weighted_cross_entropy(logits, targets, weight, reduction="mean")
    jax.block_until_ready(loss)

    # pure-JAX reference check
    xr = jnp.transpose(logits, (0, 2, 3, 1)).reshape(-1, C)
    tr = targets.reshape(-1)
    logp = jax.nn.log_softmax(xr, axis=-1)
    nll = -jnp.take_along_axis(logp, tr[:, None], axis=-1)[:, 0]
    wt = weight[tr]
    ref = jnp.sum(wt * nll) / jnp.sum(wt)
    assert jnp.allclose(loss, ref, rtol=1e-5, atol=1e-5), (loss, ref)

    print("KERNEL_OK")
</pallas_src>

<mosaic_0001>
module attributes {stable_mosaic.version = 11 : i64} {
  func.func @_weighted_ce_kernel(%arg0: i32, %arg1: i32, %arg2: memref<1x4x8x128xf32, #tpu.memory_space<vmem>>, %arg3: memref<1x1x8x128xi32, #tpu.memory_space<vmem>>, %arg4: memref<4x1x1xf32, #tpu.memory_space<vmem>>, %arg5: memref<1x1x8x128xf32, #tpu.memory_space<vmem>>, %arg6: memref<1x1x8x128xf32, #tpu.memory_space<vmem>>) attributes {dimension_semantics = [#tpu.dimension_semantics<parallel>, #tpu.dimension_semantics<parallel>], iteration_bounds = array<i64: 2, 1>, scalar_prefetch = 0 : i64, scratch_operands = 0 : i64, tpu.core_type = #tpu.core_type<tc>, window_params = [{transform_indices = @transform_0, window_bounds = array<i64: 1, 4, 8, 128>}, {transform_indices = @transform_1, window_bounds = array<i64: 1, 1, 8, 128>}, {pipeline_mode = #tpu.pipeline_mode<synchronous>, transform_indices = @transform_2, window_bounds = array<i64: 4, 1, 1>}, {transform_indices = @transform_3, window_bounds = array<i64: 1, 1, 8, 128>}, {transform_indices = @transform_4, window_bounds = array<i64: 1, 1, 8, 128>}]} {
    %c0 = arith.constant 0 : index
    %c0_0 = arith.constant 0 : index
    %c0_1 = arith.constant 0 : index
    %c0_2 = arith.constant 0 : index
    %0 = vector.load %arg2[%c0, %c0_0, %c0_1, %c0_2] : memref<1x4x8x128xf32, #tpu.memory_space<vmem>>, vector<1x4x8x128xf32>
    %1 = vector.shape_cast %0 : vector<1x4x8x128xf32> to vector<4x8x128xf32>
    %c0_3 = arith.constant 0 : index
    %c0_4 = arith.constant 0 : index
    %c0_5 = arith.constant 0 : index
    %c0_6 = arith.constant 0 : index
    %2 = vector.load %arg3[%c0_3, %c0_4, %c0_5, %c0_6] : memref<1x1x8x128xi32, #tpu.memory_space<vmem>>, vector<1x1x8x128xi32>
    %3 = vector.shape_cast %2 : vector<1x1x8x128xi32> to vector<1x8x128xi32>
    %c0_7 = arith.constant 0 : index
    %c0_8 = arith.constant 0 : index
    %c0_9 = arith.constant 0 : index
    %4 = vector.load %arg4[%c0_7, %c0_8, %c0_9] : memref<4x1x1xf32, #tpu.memory_space<vmem>>, vector<4x1x1xf32>
    %cst = arith.constant dense<0xFF800000> : vector<8x128xf32>
    %5 = vector.multi_reduction <maximumf>, %1, %cst [0] : vector<4x8x128xf32> to vector<8x128xf32>
    %6 = vector.shape_cast %5 : vector<8x128xf32> to vector<1x8x128xf32>
    %7 = vector.broadcast %6 : vector<1x8x128xf32> to vector<4x8x128xf32>
    %8 = arith.subf %1, %7 : vector<4x8x128xf32>
    %9 = math.exp %8 : vector<4x8x128xf32>
    %cst_10 = arith.constant dense<0.000000e+00> : vector<8x128xf32>
    %10 = vector.multi_reduction <add>, %9, %cst_10 [0] : vector<4x8x128xf32> to vector<8x128xf32>
    %11 = vector.shape_cast %10 : vector<8x128xf32> to vector<1x8x128xf32>
    %12 = math.log %11 : vector<1x8x128xf32>
    %13 = arith.addf %6, %12 : vector<1x8x128xf32>
    %14 = tpu.iota {dimensions = array<i32: 0>} : vector<4x1x1xi32>
    %15 = vector.broadcast %14 : vector<4x1x1xi32> to vector<4x8x128xi32>
    %16 = vector.broadcast %3 : vector<1x8x128xi32> to vector<4x8x128xi32>
    %17 = arith.cmpi eq, %15, %16 : vector<4x8x128xi32>
    %cst_11 = arith.constant 0.000000e+00 : f32
    %18 = vector.broadcast %cst_11 : f32 to vector<4x8x128xf32>
    %19 = arith.select %17, %1, %18 : vector<4x8x128xi1>, vector<4x8x128xf32>
    %cst_12 = arith.constant dense<0.000000e+00> : vector<8x128xf32>
    %20 = vector.multi_reduction <add>, %19, %cst_12 [0] : vector<4x8x128xf32> to vector<8x128xf32>
    %21 = vector.shape_cast %20 : vector<8x128xf32> to vector<1x8x128xf32>
    %cst_13 = arith.constant 0.000000e+00 : f32
    %22 = vector.shape_cast %4 : vector<4x1x1xf32> to vector<4x1x1xf32>
    %23 = vector.broadcast %22 : vector<4x1x1xf32> to vector<4x8x128xf32>
    %24 = vector.broadcast %cst_13 : f32 to vector<4x8x128xf32>
    %25 = arith.select %17, %23, %24 : vector<4x8x128xi1>, vector<4x8x128xf32>
    %cst_14 = arith.constant dense<0.000000e+00> : vector<8x128xf32>
    %26 = vector.multi_reduction <add>, %25, %cst_14 [0] : vector<4x8x128xf32> to vector<8x128xf32>
    %27 = vector.shape_cast %26 : vector<8x128xf32> to vector<1x8x128xf32>
    %28 = arith.subf %13, %21 : vector<1x8x128xf32>
    %29 = arith.mulf %27, %28 : vector<1x8x128xf32>
    %30 = tpu.iota {dimensions = array<i32: 1>} : vector<1x8x128xi32>
    %31 = tpu.iota {dimensions = array<i32: 2>} : vector<1x8x128xi32>
    %c8_i32 = arith.constant 8 : i32
    %32 = arith.muli %arg1, %c8_i32 : i32
    %33 = vector.broadcast %32 : i32 to vector<1x8x128xi32>
    %34 = arith.addi %33, %30 : vector<1x8x128xi32>
    %c128_i32 = arith.constant 128 : i32
    %35 = vector.broadcast %c128_i32 : i32 to vector<1x8x128xi32>
    %36 = arith.muli %34, %35 : vector<1x8x128xi32>
    %37 = arith.addi %36, %31 : vector<1x8x128xi32>
    %c256_i32 = arith.constant 256 : i32
    %38 = vector.broadcast %c256_i32 : i32 to vector<1x8x128xi32>
    %39 = arith.cmpi slt, %37, %38 : vector<1x8x128xi32>
    %cst_15 = arith.constant 0.000000e+00 : f32
    %40 = vector.broadcast %cst_15 : f32 to vector<1x8x128xf32>
    %41 = arith.select %39, %29, %40 : vector<1x8x128xi1>, vector<1x8x128xf32>
    %cst_16 = arith.constant 0.000000e+00 : f32
    %42 = vector.broadcast %cst_16 : f32 to vector<1x8x128xf32>
    %43 = arith.select %39, %27, %42 : vector<1x8x128xi1>, vector<1x8x128xf32>
    %cst_17 = arith.constant dense<0.000000e+00> : vector<8x128xf32>
    %44 = vector.multi_reduction <add>, %41, %cst_17 [0] : vector<1x8x128xf32> to vector<8x128xf32>
    %c0_18 = arith.constant 0 : index
    %c0_19 = arith.constant 0 : index
    %c0_20 = arith.constant 0 : index
    %c0_21 = arith.constant 0 : index
    %45 = vector.load %arg5[%c0_18, %c0_19, %c0_20, %c0_21] : memref<1x1x8x128xf32, #tpu.memory_space<vmem>>, vector<1x1x8x128xf32>
    %46 = vector.shape_cast %45 : vector<1x1x8x128xf32> to vector<8x128xf32>
    %47 = vector.shape_cast %44 : vector<8x128xf32> to vector<1x1x8x128xf32>
    tpu.vector_store %arg5[%c0_18, %c0_19, %c0_20, %c0_21], %47 {strides = array<i32>} : memref<1x1x8x128xf32, #tpu.memory_space<vmem>>, vector<1x1x8x128xf32>,
    %cst_22 = arith.constant dense<0.000000e+00> : vector<8x128xf32>
    %48 = vector.multi_reduction <add>, %43, %cst_22 [0] : vector<1x8x128xf32> to vector<8x128xf32>
    %c0_23 = arith.constant 0 : index
    %c0_24 = arith.constant 0 : index
    %c0_25 = arith.constant 0 : index
    %c0_26 = arith.constant 0 : index
    %49 = vector.load %arg6[%c0_23, %c0_24, %c0_25, %c0_26] : memref<1x1x8x128xf32, #tpu.memory_space<vmem>>, vector<1x1x8x128xf32>
    %50 = vector.shape_cast %49 : vector<1x1x8x128xf32> to vector<8x128xf32>
    %51 = vector.shape_cast %48 : vector<8x128xf32> to vector<1x1x8x128xf32>
    tpu.vector_store %arg6[%c0_23, %c0_24, %c0_25, %c0_26], %51 {strides = array<i32>} : memref<1x1x8x128xf32, #tpu.memory_space<vmem>>, vector<1x1x8x128xf32>,
    return
  }
  func.func @transform_0(%arg0: i32, %arg1: i32) -> (i32, i32, i32, i32) {
    %c0_i32 = arith.constant 0 : i32
    %c0_i32_0 = arith.constant 0 : i32
    %c0_i32_1 = arith.constant 0 : i32
    return %arg0, %c0_i32, %arg1, %c0_i32_0 : i32, i32, i32, i32
  }
  func.func @transform_1(%arg0: i32, %arg1: i32) -> (i32, i32, i32, i32) {
    %c0_i32 = arith.constant 0 : i32
    %c0_i32_0 = arith.constant 0 : i32
    %c0_i32_1 = arith.constant 0 : i32
    return %arg0, %c0_i32, %arg1, %c0_i32_0 : i32, i32, i32, i32
  }
  func.func @transform_2(%arg0: i32, %arg1: i32) -> (i32, i32, i32) {
    %c0_i32 = arith.constant 0 : i32
    %c0_i32_0 = arith.constant 0 : i32
    %c0_i32_1 = arith.constant 0 : i32
    %c0_i32_2 = arith.constant 0 : i32
    return %c0_i32, %c0_i32_0, %c0_i32_1 : i32, i32, i32
  }
  func.func @transform_3(%arg0: i32, %arg1: i32) -> (i32, i32, i32, i32) {
    %c0_i32 = arith.constant 0 : i32
    %c0_i32_0 = arith.constant 0 : i32
    %c0_i32_1 = arith.constant 0 : i32
    return %arg0, %arg1, %c0_i32, %c0_i32_0 : i32, i32, i32, i32
  }
  func.func @transform_4(%arg0: i32, %arg1: i32) -> (i32, i32, i32, i32) {
    %c0_i32 = arith.constant 0 : i32
    %c0_i32_0 = arith.constant 0 : i32
    %c0_i32_1 = arith.constant 0 : i32
    return %arg0, %arg1, %c0_i32, %c0_i32_0 : i32, i32, i32, i32
  }
}

</mosaic_0001>

<bundles_post_ra>
// kernel: tpu_custom_call.1
= control target key start
LH: loop header
LB: loop body
LE: loop exit
PB: predicated region body
PF: predicated region fallthrough
CT: control target
= control target key end

     0   :  { %s1067_s0 = inlined_call_operand.hbm [shape: f32[2,4,8,128], index: 0, kind: input, shape index: {}]   ;;  %s1068_s1 = inlined_call_operand.hbm [shape: s32[2,1,8,128], index: 1, kind: input, shape index: {}]   ;;  %s1069_s2 = inlined_call_operand.vmem [shape: f32[4,1,1], index: 2, kind: input, shape index: {}]   ;;  %s1070_s3 = inlined_call_operand.hbm [shape: f32[2,1,8,128], index: 3, kind: output, shape index: {0}]   ;;  %s1071_s4 = inlined_call_operand.hbm [shape: f32[2,1,8,128], index: 4, kind: output, shape index: {1}]  }
   0x1   :  { %1072 = sst [smem:[#allocation14_spill]] %s1067_s0 }
   0x2   :  { %10 = vsyncpa [#allocation3], 0 }
   0x3   :  { %12 = vsyncpa [#allocation3 + $0x1], 0 }
   0x4   :  { %13 = vsyncpa [#allocation6], 0 }
   0x5   :  { %15 = vsyncpa [#allocation6 + $0x1], 0 }
   0x6   :  { %16 = vsyncpa [#allocation4], 0 }
   0x7   :  { %18 = vsyncpa [#allocation4 + $0x1], 0 }
   0x8   :  { %19 = vsyncpa [#allocation9], 0 }
   0x9   :  { %21 = vsyncpa [#allocation9 + $0x1], 0  ;;  %s876_s15 = smov 0   ;;  %s878_s16 = smov 0  }
   0xa   :  { %s880_s17 = smov 0   ;;  %s882_s18 = smov 0  }
   0xb   :  { %s884_s19 = smov 0   ;;  %s886_s20 = smov 0  }
   0xc LB: > { %s556_s21 = sadd.s32 4294967295, %s846_s20   ;;  %s557_s22 = sadd.s32 4294967294, %s846_s20   ;;  %s846_s20 = sphi %s886_s20, %s27_s20   ;;  %s842_s19 = sphi %s884_s19, %s1083_s19   ;;  %s838_s18 = sphi %s882_s18, %s1082_s18   ;;  %s834_s17 = sphi %s880_s17, %s1081_s17   ;;  %s830_s16 = sphi %s878_s16, %s1080_s16   ;;  %s826_s15 = sphi %s876_s15, %s1079_s15  }
   0xd   : > { %s39_s23 = sadd.s32 1, %s842_s19  ;;  %s48_s24 = sadd.s32 1, %s834_s17 }
   0xe   : > { %p41_p0 = scmp.ge.s32.totalorder %s39_s23, 2  ;;  %p55_p1 = scmp.ne.s32.totalorder %s834_s17, %s830_s16 }
   0xf   : > { %p56_p2 = scmp.eq.s32.totalorder %s846_s20, 0  ;;  %p61_p3 = scmp.ne.s32.totalorder %s830_s16, %s826_s15 }
  0x10   : > { %s1085_s23 = smov (%p41_p0, %s39_s23), 0  ;;  %p62_p5 = scmp.eq.s32.totalorder %s556_s21, 0 }
  0x11   : > { %p917_p4 = por %p56_p2, %p55_p1  ;;  %s43_s26 = ssub.s32 %s842_s19, %s1085_s23 }
  0x12   : > { %p136_p6 = scmp.eq.s32.totalorder %s556_s21, 1  ;;  %p46_p7 = scmp.eq.s32.totalorder %s43_s26, 0 }
  0x13   : > { %p923_p8 = por %p62_p5, %p61_p3  ;;  %p142_p10 = scmp.eq.s32.totalorder %s557_s22, 1 }
  0x14   : > { %p927_p9 = por %p136_p6, %p55_p1  ;;  %p559_p12 = scmp.ge.s32.totalorder %s846_s20, 2 }
  0x15   : > { %s932_s29 = scalar_select %p46_p7, %s834_s17, %s48_s24  }
  0x16   : > { %p934_p11 = por %p142_p10, %p61_p3  ;;  %p599_p13 = scmp.lt.s32.totalorder %s846_s20, 2 }
  0x17   : > { %s193_s5 = sand.u32 1, %s834_s17   ;;  %s576_s7 = sshll.u32 %s842_s19, 5 }
  0x18   : > { %s560_s6 = sshll.u32 %s193_s5, 5  ;;  %s1077_s0 = sld [smem:[#allocation14_spill]] }
  0x19   : > { %s197_s11 = scalar_lea.vmem [#allocation2], %s560_s6  ;;  %p947_p0 = pnand %p599_p13, %p917_p4 }
  0x1a   : > { %s206_s12 = sshll.u32 %s197_s11, 4  ;;  %p565_p1 = scmp.ge.s32.totalorder %s846_s20, 1  ;;  %s207_s12 = int_to_ptr.vmem [resolvable:$true] %s206_s12 }
  0x1b   : > { %s194_s21 = scalar_lea.sflag [#allocation3], %s193_s5  ;;  %s848_s22 = smov 128  }
  0x1c   : > { %s849_s24 = smov 8   ;;  %p234_p2 = scmp.lt.s32.totalorder %s846_s20, 3 }
  0x1d   : > { %s563_s26 = sshll.u32 %s193_s5, 3  ;;  %s564_s6 = sshll.u32 %s842_s19, 3 }
  0x1e   : > { %s203_s10 = scalar_lea.hbm %s1077_s0, %s576_s7  ;;  %p235_p3 = pnand %p565_p1, %p234_p2 }
  0x1f   : > { %s204_s13 = sshll.u32 %s203_s10, 4  ;;  %s225_s25 = scalar_lea.hbm %s1068_s1, %s564_s6  ;;  %s205_s13 = int_to_ptr.hbm [resolvable:$true] %s204_s13 }
  0x20   : > { %588 = dma.hbm_to_vmem [thread:$0]  (!%p947_p0), %s205_s13, 512, %s207_s12, %s194_s21, %s848_s22, %s848_s22, %s849_s24  }
  0x21   : > { %s220_s9 = scalar_lea.vmem [#allocation5], %s563_s26  ;;  %s227_s11 = sshll.u32 %s225_s25, 4  ;;  %s228_s11 = int_to_ptr.hbm [resolvable:$true] %s227_s11 }
  0x22   : > { %s229_s10 = sshll.u32 %s220_s9, 4  ;;  %s217_s0 = scalar_lea.sflag [#allocation6], %s193_s5  ;;  %s230_s10 = int_to_ptr.vmem [resolvable:$true] %s229_s10 }
  0x23   : > { %591 = dma.hbm_to_vmem [thread:$0]  (!%p947_p0), %s228_s11, 128, %s230_s10, %s217_s0  }
  0x24   : > { %238 = sbr.rel (%p235_p3) target bundleno = 194 (0xc2), region = 32  ;;  %s962_s12 = sand.u32 (!%p235_p3), 1, %s830_s16  }
  0x25   : > { %s566_s13 = sshll.u32 (!%p235_p3), %s962_s12, 5  ;;  %s241_s21 = scalar_lea.sflag (!%p235_p3), [#allocation3], %s962_s12 }
  0x26   : > { %s244_s22 = scalar_lea.vmem (!%p235_p3), [#allocation2], %s566_s13 }
  0x29   : > { %809 = dma.done.wait (%p923_p8), %s241_s21, 512  }
  0x2a   : > { %811 = vsyncadd (%p923_p8), %s241_s21, 4294966784  ;;  %s971_s5 = sshll.u32 %s962_s12, 3  ;;  %s251_s0 = scalar_lea.sflag [#allocation6], %s962_s12 }
  0x2b   : > { %s254_s14 = scalar_lea.vmem [#allocation5], %s971_s5 }
  0x2c   : > { %813 = dma.done.wait (%p923_p8), %s251_s0, 128  }
  0x2d   : > { %815 = vsyncadd (%p923_p8), %s251_s0, 4294967168  ;;  %v850_v0 = vmov 0   ;;  %v654_v1 = vld [vmem:[%s1069_s2 + $0x2] ss:$0 sm:$0xff]  ;;  %v655_v2 = vld [vmem:[%s1069_s2] ss:$0 sm:$0xff]  ;;  %v364_v29 = vlaneseq }
  0x2e   : > { %653 = vset.pattern.permute.xlu1 %v850_v0  ;;  %652 = vset.pattern.permute.xlu0 %v850_v0  ;;  %v656_v3 = vld [vmem:[%s1069_s2 + $0x3] ss:$0 sm:$0xff]  ;;  %v657_v4 = vld [vmem:[%s1069_s2 + $0x1] ss:$0 sm:$0xff]  ;;  %v292_v5 = vld [vmem:[%s244_s22 + $0x10] sm:$0xff]  ;;  %s572_s10 = sshll.u32 %s838_s18, 3 }
  0x2f   : > { %348 = vperm.xlu1 %653, %v654_v1   ;;  %340 = vperm.xlu0 %652, %v655_v2   ;;  %v290_v6 = vld [vmem:[%s244_s22] sm:$0xff]  ;;  %v293_v7 = vld [vmem:[%s244_s22 + $0x18] sm:$0xff]  ;;  %v291_v8 = vld [vmem:[%s244_s22 + $0x8] sm:$0xff]  ;;  %v365_v36 = vshrl.u32 %v364_v29, 7  ;;  %v367_v40 = vand.u32 127, %v364_v29  ;;  %s412_s21 = scalar_lea.hbm %s1071_s4, %s572_s10  ;;  %s397_s18 = scalar_lea.hbm %s1070_s3, %s572_s10 }
  0x30   : > { %v300_v9 = vmax.f32 %v292_v5, %v293_v7  ;;  %v299_v10 = vmax.f32 %v290_v6, %v291_v8  ;;  %v294_v27 = vld [vmem:[%s254_s14] sm:$0xff]  ;;  %s289_s14 = scalar_lea.vmem [#allocation8], %s971_s5  ;;  %s416_s26 = sshll.u32 %s412_s21, 4  ;;  %s417_s26 = int_to_ptr.hbm [resolvable:$true] %s416_s26 }
  0x31   : > { %vm321_vm0 = vcmp.eq.s32.totalorder %v294_v27, 1  ;;  %vm320_vm1 = vcmp.eq.s32.totalorder %v294_v27, 0  ;;  %vm322_vm2 = vcmp.eq.s32.totalorder %v294_v27, 2  ;;  %vm323_vm3 = vcmp.eq.s32.totalorder %v294_v27, 3  ;;  %s1008_s24 = sshll.u32 %s289_s14, 4  ;;  %s282_s6 = scalar_lea.vmem [#allocation7], %s971_s5  ;;  %s415_s24 = int_to_ptr.vmem [resolvable:$true] %s1008_s24 }
  0x32   : > { %v301_v11 = vmax.f32 %v299_v10, %v300_v9  ;;  %v324_v28 = vsel %vm320_vm1, %v290_v6, 0.0  ;;  %v325_v30 = vsel %vm321_vm0, %v291_v8, 0.0  ;;  %v326_v35 = vsel %vm322_vm2, %v292_v5, 0.0  ;;  %s1012_s7 = sshll.u32 %s282_s6, 4  ;;  %s401_s8 = sshll.u32 %s397_s18, 4  ;;  %s400_s7 = int_to_ptr.vmem [resolvable:$true] %s1012_s7  ;;  %s1016_s8 = int_to_ptr.hbm [resolvable:$true] %s401_s8 }
  0x33   : > { %v328_v33 = vadd.f32 %v325_v30, %v324_v28  ;;  %v327_v39 = vsel %vm323_vm3, %v293_v7, 0.0  ;;  %v371_v41 = vmul.u32 128, %v365_v36  ;;  %s386_s25 = scalar_lea.sflag [#allocation9], %s962_s12  ;;  %s742_s9 = sshra.s32 %s417_s26, 4  ;;  %s743_s9 = int_to_ptr.hbm [resolvable:$true] %s742_s9 }
  0x34   : > { %v302_v12 = vsub.f32 %v290_v6, %v301_v11  ;;  %v303_v13 = vsub.f32 %v291_v8, %v301_v11  ;;  %v304_v15 = vsub.f32 %v292_v5, %v301_v11  ;;  %v305_v17 = vsub.f32 %v293_v7, %v301_v11  ;;  %s744_s27 = scalar_lea.hbm %s743_s9, 8  ;;  %s748_s11 = scalar_lea.hbm %s1071_s4, 16 }
  0x35   : > { %v329_v38 = vadd.f32 %v328_v33, %v326_v35  ;;  %v372_v46 = vadd.s32 %v371_v41, %v367_v40  ;;  %p745_p4 = scmp.ne.s32.totalorder %s743_s9, %s744_s27  ;;  %p749_p7 = scmp.lt.s32.totalorder %s743_s9, %s1071_s4 }
  0x36   : > { %v306_v14 = vmul.f32 1.442695, %v302_v12  ;;  %v308_v16 = vmul.f32 1.442695, %v303_v13  ;;  %v310_v18 = vmul.f32 1.442695, %v304_v15  ;;  %p750_p8 = scmp.lt.s32.totalorder %s748_s11, %s744_s27 }
  0x37   : > { %352 = vperm.xlu1 %653, %v656_v3   ;;  %344 = vperm.xlu0 %652, %v657_v4   ;;  %v312_v19 = vmul.f32 1.442695, %v305_v17  ;;  %v330_v44 = vadd.f32 %v329_v38, %v327_v39  ;;  %vm373_vm4 = vcmp.lt.s32.totalorder %v372_v46, 256  ;;  %p746_p5 = pnand %p745_p4, %p927_p9 }
  0x38   : > { %658 = vpow2.f32 %v306_v14  ;;  %p751_p10 = por %p750_p8, %p749_p7 }
  0x39   : > { %660 = vpow2.f32 %v308_v16  ;;  %p747_p6 = pneg %p746_p5 }
  0x3a   : > { %662 = vpow2.f32 %v310_v18 }
  0x3b   : > { %664 = vpow2.f32 %v312_v19  ;;  %p752_p13 = pnand %p751_p10, %p747_p6 }
  0x3e   : > { %v659_v20 = vpop.eup %658 }
  0x3f   : > { %v661_v21 = vpop.eup %660 }
  0x40   : > { %v314_v22 = vadd.f32 %v661_v21, %v659_v20  ;;  %v663_v23 = vpop.eup %662 }
  0x41   : > { %v665_v25 = vpop.eup %664 }
  0x42   : > { %v315_v24 = vadd.f32 %v663_v23, %v314_v22 }
  0x44   : > { %v316_v26 = vadd.f32 %v665_v25, %v315_v24 }
  0x46   : > { %666 = vlog2.f32 %v316_v26 }
  0x4c   : > { %v667_v34 = vpop.eup %666 }
  0x4d   : > { %v318_v37 = vmul.f32 0.6931472, %v667_v34 }
  0x4f   : > { %v319_v43 = vadd.f32 %v318_v37, %v301_v11 }
  0x51   : > { %v362_v52 = vsub.f32 %v319_v43, %v330_v44 }
  0xa1   : > { %v349_v31 = vpop.permute.xlu1 %348  ;;  %v341_v32 = vpop.permute.xlu0 %340 }
  0xa2   : > { %v355_v45 = vsel %vm320_vm1, %v341_v32, 0.0  ;;  %v357_v50 = vsel %vm322_vm2, %v349_v31, 0.0 }
  0xa9   : > { %v345_v42 = vpop.permute.xlu0 %344  ;;  %v353_v48 = vpop.permute.xlu1 %352 }
  0xaa   : > { %v356_v47 = vsel %vm321_vm0, %v345_v42, 0.0  ;;  %v358_v53 = vsel %vm323_vm3, %v353_v48, 0.0 }
  0xab   : > { %v359_v49 = vadd.f32 %v356_v47, %v355_v45 }
  0xad   : > { %v360_v51 = vadd.f32 %v359_v49, %v357_v50 }
  0xaf   : > { %v361_v54 = vadd.f32 %v360_v51, %v358_v53 }
  0xb1   : > { %v363_v55 = vmul.f32 %v362_v52, %v361_v54  ;;  %v375_v56 = vsel %vm373_vm4, %v361_v54, 0.0 }
  0xb2   : > { %379 = vst [vmem:[%s289_s14] sm:$0xff] %v375_v56 }
  0xb3   : > { %v374_v57 = vsel %vm373_vm4, %v363_v55, 0.0 }
  0xb4   : > { %755 = shalt.err (!%p752_p13)
}
  0xb5   : > { %582 = dma.vmem_to_hbm [thread:$0]  (%p927_p9), %s415_s24, 128, %s417_s26, %s386_s25   ;;  %377 = vst [vmem:[%s282_s6] sm:$0xff] %v374_v57 }
  0xb6   : > { %s381_s22 = scalar_lea.sflag [#allocation4], %s962_s12  ;;  %s770_s0 = sshra.s32 %s1016_s8, 4  ;;  %s771_s0 = int_to_ptr.hbm [resolvable:$true] %s770_s0 }
  0xb7   : > { %s772_s18 = scalar_lea.hbm %s771_s0, 8  ;;  %s776_s27 = scalar_lea.hbm %s1070_s3, 16 }
  0xb8   : > { %p773_p0 = scmp.ne.s32.totalorder %s771_s0, %s772_s18  ;;  %p777_p3 = scmp.lt.s32.totalorder %s771_s0, %s1070_s3 }
  0xb9   : > { %p778_p4 = scmp.lt.s32.totalorder %s776_s27, %s772_s18 }
  0xba   : > { %p774_p1 = pnand %p773_p0, %p927_p9 }
  0xbb   : > { %p779_p5 = por %p778_p4, %p777_p3 }
  0xbc   : > { %p775_p2 = pneg %p774_p1 }
  0xbe   : > { %p780_p6 = pnand %p779_p5, %p775_p2 }
  0xc0   : > { %783 = shalt.err (!%p780_p6)
}
  0xc1   : > { %581 = dma.vmem_to_hbm [thread:$0]  (%p927_p9), %s400_s7, 128, %s1016_s8, %s381_s22  }
  0xc2 PF: > { %s428_s12 = sand.u32 1, %s826_s15   ;;  %p593_p7 = pnand %p559_p12, %p934_p11 }
  0xc3   : > { %s429_s24 = scalar_lea.sflag [#allocation4], %s428_s12 }
  0xc4   : > { %p594_p8 = pneg %p593_p7 }
  0xc6   : > { %817 = dma.done.wait (%p594_p8), %s429_s24, 128  }
  0xc7   : > { %819 = vsyncadd (%p594_p8), %s429_s24, 4294967168  ;;  %s439_s26 = scalar_lea.sflag [#allocation9], %s428_s12 }
  0xc8   : > { %821 = dma.done.wait (%p594_p8), %s439_s26, 128  }
  0xc9   : > { %823 = vsyncadd (%p594_p8), %s439_s26, 4294967168  ;;  %s27_s20 = sadd.s32 1, %s846_s20   ;;  %s1079_s15 = smov %s830_s16 }
  0xca   : > { %p24_p10 = scmp.ge.s32.totalorder %s27_s20, 4   ;;  %s1080_s16 = smov %s834_s17 }
  0xcb   : > { %s1081_s17 = smov %s932_s29  ;;  %s1082_s18 = smov %s842_s19 }
  0xcc   : > { %s1083_s19 = smov %s1085_s23  ;;  %26 = sbr.rel (!%p24_p10) target bundleno = 12 (0xc), region = 107 }
  0xd1   :  { %445 = vsyncpa [#allocation3], 1 }
  0xd2   :  { %447 = vsyncpa [#allocation3 + $0x1], 1 }
  0xd3   :  { %448 = vsyncpa [#allocation6], 1 }
  0xd4   :  { %450 = vsyncpa [#allocation6 + $0x1], 1 }
  0xd5   :  { %451 = vsyncpa [#allocation4], 1 }
  0xd6   :  { %453 = vsyncpa [#allocation4 + $0x1], 1 }
  0xd7   :  { %454 = vsyncpa [#allocation9], 1 }
  0xd8   :  { %456 = vsyncpa [#allocation9 + $0x1], 1 }

</bundles_post_ra>
